<compile_context>
chip_gen: v6e
topology: v6e:2x2x1
jax: 0.10.0
libtpu: 0.0.40
codegen_flags: <defaults>
</compile_context>

<pallas_src>
import functools

import jax
import jax.numpy as jnp
from jax.experimental import pallas as pl
from jax.experimental.pallas import tpu as pltpu


def _round_up(n, m):
    return ((n + m - 1) // m) * m


def _pad2(a, rows, cols):
    pr, pc = rows - a.shape[0], cols - a.shape[1]
    if pr or pc:
        a = jnp.pad(a, ((0, pr), (0, pc)))
    return a


_ONLINE_BATCH_MAX = 256  # single-grid-step cutoff for small act() batches


def _choose_batch_tile(B, batch_tile):
    """Adaptive batch tile.

    - tiny / online batches: one grid step (tb = round_up(B, 8)).
    - replay-sized batches: >= 2 balanced tiles so the "parallel" batch axis
      spans both v7x TensorCores, capped at batch_tile (VMEM headroom).
    """
    Bp8 = _round_up(max(B, 1), 8)
    if Bp8 <= _ONLINE_BATCH_MAX:
        return Bp8
    two_way = _round_up(pl.cdiv(Bp8, 2), 8)
    return max(8, min(batch_tile, two_way))


def dqn_mlp_kernel(x_ref, w1_ref, b1_ref, w2_ref, b2_ref, w3_ref, b3_ref, o_ref):
    """One batch tile of relu(relu(x@W1+b1)@W2+b2)@W3 + b3, f32 accumulate."""
    wdt = w1_ref.dtype
    x = x_ref[...]

    # Layer 1: MXU matmul -> f32 accumulator, f32 bias/ReLU epilogue on VPU.
    h1 = jnp.dot(x.astype(wdt), w1_ref[...], preferred_element_type=jnp.float32)
    h1 = jnp.maximum(h1 + b1_ref[...], 0.0)

    # Layer 2: Linear + ReLU.
    h2 = jnp.dot(h1.astype(wdt), w2_ref[...], preferred_element_type=jnp.float32)
    h2 = jnp.maximum(h2 + b2_ref[...], 0.0)

    # Layer 3: Linear (Q-values, no activation), stored at natural width A.
    q = jnp.dot(h2.astype(wdt), w3_ref[...], preferred_element_type=jnp.float32)
    o_ref[...] = (q + b3_ref[...]).astype(o_ref.dtype)


def prepare_params(params, weight_dtype=None):
    """One-time layout prep of the static params (call OUTSIDE the loop).

    Only the hidden dim is zero-padded (to a multiple of 128) so the H-wide
    matmul operands are lane-dense; state/action dims keep their natural
    width (x / Q streams stay unpadded).  Weights are cast to `weight_dtype`
    (e.g. bf16 to halve the one-off weight DMA); biases stay f32 for the f32
    epilogue.  Reuse the returned pytree for every dqn_forward call.
    """
    w1, w2, w3 = params["w1"], params["w2"], params["w3"]
    S, H = w1.shape
    A = w3.shape[1]
    Hp = _round_up(H, 128)
    wdt = weight_dtype if weight_dtype is not None else w1.dtype
    return {
        "w1": _pad2(w1, S, Hp).astype(wdt),
        "b1": _pad2(params["b1"].reshape(1, -1), 1, Hp).astype(jnp.float32),
        "w2": _pad2(w2, Hp, Hp).astype(wdt),
        "b2": _pad2(params["b2"].reshape(1, -1), 1, Hp).astype(jnp.float32),
        "w3": _pad2(w3, Hp, A).astype(wdt),
        "b3": params["b3"].reshape(1, -1).astype(jnp.float32),
    }


@functools.partial(jax.jit, static_argnames=("batch_tile",))
def dqn_forward(x, prepared, *, batch_tile=2048):
    """Q = DQN(x).  x: (B, S) f32; prepared: output of prepare_params.

    Returns (B, A) f32 Q-values.
    """
    B, S = x.shape
    Hp = prepared["w1"].shape[1]
    A = prepared["w3"].shape[1]
    assert prepared["w1"].shape[0] == S, "state_dim mismatch with prepared params"

    tb = _choose_batch_tile(B, batch_tile)
    Bp = _round_up(B, tb)
    grid = (Bp // tb,)

    # Only the batch dim is padded (to a multiple of the tile); feature dim
    # stays at its natural width S.
    xp = x if Bp == B else jnp.pad(x, ((0, Bp - B), (0, 0)))

    # Resident operands: full block + constant index_map -> fetched from HBM
    # once and kept in VMEM across the whole grid.  (Their default second
    # pipeline buffer costs <~150 KiB at H=128, so pl.Buffered(1) is
    # unnecessary headroom at these shapes.)
    res = lambda a: pl.BlockSpec(a.shape, lambda i: (0, 0))

    wbytes = sum(a.size * a.dtype.itemsize for a in prepared.values())
    cost = pl.CostEstimate(
        flops=2 * Bp * (S * Hp + Hp * Hp + Hp * A),
        transcendentals=0,
        bytes_accessed=Bp * S * 4 + wbytes + Bp * A * 4,
    )

    out = pl.pallas_call(
        dqn_mlp_kernel,
        out_shape=jax.ShapeDtypeStruct((Bp, A), jnp.float32),
        grid_spec=pltpu.PrefetchScalarGridSpec(
            num_scalar_prefetch=0,
            grid=grid,
            in_specs=[
                # streamed x tile: natural feature width (full-extent last dim)
                pl.BlockSpec((tb, S), lambda i: (i, 0)),
                res(prepared["w1"]), res(prepared["b1"]),
                res(prepared["w2"]), res(prepared["b2"]),
                res(prepared["w3"]), res(prepared["b3"]),
            ],
            # streamed Q tile: natural action width (no 32x writeback inflation)
            out_specs=pl.BlockSpec((tb, A), lambda i: (i, 0)),
        ),
        compiler_params=pltpu.CompilerParams(
            dimension_semantics=("parallel",),  # v7x: batch tiles over both TCs
        ),
        cost_estimate=cost,
    )(xp, prepared["w1"], prepared["b1"], prepared["w2"], prepared["b2"],
      prepared["w3"], prepared["b3"])

    # Drop only the batch padding (action dim is already exact).
    return out if Bp == B else out[:B]


def init_params(key, state_dim, action_dim, hidden_dim=128):
    """PyTorch nn.Linear-style init: U(-1/sqrt(fan_in), +1/sqrt(fan_in)).

    Weights stored (in, out) so the kernel computes x @ W; biases (1, out) f32.
    """
    def linear(k, fan_in, fan_out):
        kw, kb = jax.random.split(k)
        bound = 1.0 / jnp.sqrt(jnp.float32(fan_in))
        w = jax.random.uniform(kw, (fan_in, fan_out), jnp.float32, -bound, bound)
        b = jax.random.uniform(kb, (1, fan_out), jnp.float32, -bound, bound)
        return w, b

    k1, k2, k3 = jax.random.split(key, 3)
    w1, b1 = linear(k1, state_dim, hidden_dim)
    w2, b2 = linear(k2, hidden_dim, hidden_dim)
    w3, b3 = linear(k3, hidden_dim, action_dim)
    return {"w1": w1, "b1": b1, "w2": w2, "b2": b2, "w3": w3, "b3": b3}


def reference_forward(x, p):
    """Pure-JAX f32 reference on the original (unpadded) params."""
    h1 = jnp.maximum(x @ p["w1"] + p["b1"], 0.0)
    h2 = jnp.maximum(h1 @ p["w2"] + p["b2"], 0.0)
    return h2 @ p["w3"] + p["b3"]


if __name__ == "__main__":
    key = jax.random.PRNGKey(0)
    k_params, k_params2, k_x, k_xb = jax.random.split(key, 4)

    # Small shapes consistent with the module.
    batch, state_dim, action_dim, hidden_dim = 2, 8, 4, 32

    # --- f32 path, tiny online batch: single grid tile, hidden padded 32->128.
    params = init_params(k_params, state_dim, action_dim, hidden_dim)
    prepared = prepare_params(params)                      # one-time pad/cast
    x = jax.random.normal(k_x, (batch, state_dim), jnp.float32)
    q = jax.block_until_ready(dqn_forward(x, prepared))
    q_ref = reference_forward(x, params)
    assert q.shape == (batch, action_dim)
    assert jnp.allclose(q, q_ref, atol=1e-5, rtol=1e-5), "f32 mismatch vs JAX reference"

    # --- bf16-resident weights, replay-sized batch, module-default hidden=128:
    #     exercises the multi-tile "parallel" batch grid (2 tiles -> both v7x
    #     TCs) and the halved-weight-DMA path.  Tolerance covers expected
    #     bf16-activation precision divergence vs the f32 reference.
    params128 = init_params(k_params2, state_dim, action_dim, 128)
    prepared_bf16 = prepare_params(params128, weight_dtype=jnp.bfloat16)
    xb = jax.random.normal(k_xb, (512, state_dim), jnp.float32)
    qb = jax.block_until_ready(dqn_forward(xb, prepared_bf16))
    qb_ref = reference_forward(xb, params128)
    assert qb.shape == (512, action_dim)
    assert jnp.allclose(qb, qb_ref, atol=5e-2, rtol=5e-2), "bf16 mismatch vs JAX reference"

    print("KERNEL_OK")
</pallas_src>

<mosaic_0001>
module attributes {stable_mosaic.version = 11 : i64} {
  func.func @dqn_mlp_kernel(%arg0: i32, %arg1: memref<8x8xf32, #tpu.memory_space<vmem>>, %arg2: memref<8x128xf32, #tpu.memory_space<vmem>>, %arg3: memref<1x128xf32, #tpu.memory_space<vmem>>, %arg4: memref<128x128xf32, #tpu.memory_space<vmem>>, %arg5: memref<1x128xf32, #tpu.memory_space<vmem>>, %arg6: memref<128x4xf32, #tpu.memory_space<vmem>>, %arg7: memref<1x4xf32, #tpu.memory_space<vmem>>, %arg8: memref<8x4xf32, #tpu.memory_space<vmem>>) attributes {dimension_semantics = [#tpu.dimension_semantics<parallel>], iteration_bounds = array<i64: 1>, scalar_prefetch = 0 : i64, scratch_operands = 0 : i64, tpu.core_type = #tpu.core_type<tc>, window_params = [{transform_indices = @transform_0, window_bounds = array<i64: 8, 8>}, {pipeline_mode = #tpu.pipeline_mode<synchronous>, transform_indices = @transform_1, window_bounds = array<i64: 8, 128>}, {pipeline_mode = #tpu.pipeline_mode<synchronous>, transform_indices = @transform_2, window_bounds = array<i64: 1, 128>}, {pipeline_mode = #tpu.pipeline_mode<synchronous>, transform_indices = @transform_3, window_bounds = array<i64: 128, 128>}, {pipeline_mode = #tpu.pipeline_mode<synchronous>, transform_indices = @transform_4, window_bounds = array<i64: 1, 128>}, {pipeline_mode = #tpu.pipeline_mode<synchronous>, transform_indices = @transform_5, window_bounds = array<i64: 128, 4>}, {pipeline_mode = #tpu.pipeline_mode<synchronous>, transform_indices = @transform_6, window_bounds = array<i64: 1, 4>}, {transform_indices = @transform_7, window_bounds = array<i64: 8, 4>}]} {
    %c0 = arith.constant 0 : index
    %c0_0 = arith.constant 0 : index
    %0 = vector.load %arg1[%c0, %c0_0] : memref<8x8xf32, #tpu.memory_space<vmem>>, vector<8x8xf32>
    %c0_1 = arith.constant 0 : index
    %c0_2 = arith.constant 0 : index
    %1 = vector.load %arg2[%c0_1, %c0_2] : memref<8x128xf32, #tpu.memory_space<vmem>>, vector<8x128xf32>
    %cst = arith.constant dense<0.000000e+00> : vector<8x128xf32>
    %2 = tpu.matmul %0, %1, %cst {dimension_numbers = #tpu.dot_dimension_numbers<[1], [0], [0], [1], [0, 0, 1, 1], [], []>} : vector<8x8xf32>, vector<8x128xf32>, vector<8x128xf32> -> vector<8x128xf32>
    %c0_3 = arith.constant 0 : index
    %c0_4 = arith.constant 0 : index
    %3 = vector.load %arg3[%c0_3, %c0_4] : memref<1x128xf32, #tpu.memory_space<vmem>>, vector<1x128xf32>
    %4 = vector.broadcast %3 : vector<1x128xf32> to vector<8x128xf32>
    %5 = arith.addf %2, %4 : vector<8x128xf32>
    %cst_5 = arith.constant 0.000000e+00 : f32
    %6 = vector.broadcast %cst_5 : f32 to vector<8x128xf32>
    %7 = arith.maximumf %5, %6 : vector<8x128xf32>
    %c0_6 = arith.constant 0 : index
    %c0_7 = arith.constant 0 : index
    %8 = vector.load %arg4[%c0_6, %c0_7] : memref<128x128xf32, #tpu.memory_space<vmem>>, vector<128x128xf32>
    %cst_8 = arith.constant dense<0.000000e+00> : vector<8x128xf32>
    %9 = tpu.matmul %7, %8, %cst_8 {dimension_numbers = #tpu.dot_dimension_numbers<[1], [0], [0], [1], [0, 0, 1, 1], [], []>} : vector<8x128xf32>, vector<128x128xf32>, vector<8x128xf32> -> vector<8x128xf32>
    %c0_9 = arith.constant 0 : index
    %c0_10 = arith.constant 0 : index
    %10 = vector.load %arg5[%c0_9, %c0_10] : memref<1x128xf32, #tpu.memory_space<vmem>>, vector<1x128xf32>
    %11 = vector.broadcast %10 : vector<1x128xf32> to vector<8x128xf32>
    %12 = arith.addf %9, %11 : vector<8x128xf32>
    %cst_11 = arith.constant 0.000000e+00 : f32
    %13 = vector.broadcast %cst_11 : f32 to vector<8x128xf32>
    %14 = arith.maximumf %12, %13 : vector<8x128xf32>
    %c0_12 = arith.constant 0 : index
    %c0_13 = arith.constant 0 : index
    %15 = vector.load %arg6[%c0_12, %c0_13] : memref<128x4xf32, #tpu.memory_space<vmem>>, vector<128x4xf32>
    %cst_14 = arith.constant dense<0.000000e+00> : vector<8x4xf32>
    %16 = tpu.matmul %14, %15, %cst_14 {dimension_numbers = #tpu.dot_dimension_numbers<[1], [0], [0], [1], [0, 0, 1, 1], [], []>} : vector<8x128xf32>, vector<128x4xf32>, vector<8x4xf32> -> vector<8x4xf32>
    %c0_15 = arith.constant 0 : index
    %c0_16 = arith.constant 0 : index
    %17 = vector.load %arg7[%c0_15, %c0_16] : memref<1x4xf32, #tpu.memory_space<vmem>>, vector<1x4xf32>
    %18 = vector.broadcast %17 : vector<1x4xf32> to vector<8x4xf32>
    %19 = arith.addf %16, %18 : vector<8x4xf32>
    %c0_17 = arith.constant 0 : index
    %c0_18 = arith.constant 0 : index
    %20 = vector.load %arg8[%c0_17, %c0_18] : memref<8x4xf32, #tpu.memory_space<vmem>>, vector<8x4xf32>
    tpu.vector_store %arg8[%c0_17, %c0_18], %19 {strides = array<i32>} : memref<8x4xf32, #tpu.memory_space<vmem>>, vector<8x4xf32>,
    return
  }
  func.func @transform_0(%arg0: i32) -> (i32, i32) {
    %c0_i32 = arith.constant 0 : i32
    %c0_i32_0 = arith.constant 0 : i32
    return %arg0, %c0_i32 : i32, i32
  }
  func.func @transform_1(%arg0: i32) -> (i32, i32) {
    %c0_i32 = arith.constant 0 : i32
    %c0_i32_0 = arith.constant 0 : i32
    %c0_i32_1 = arith.constant 0 : i32
    return %c0_i32, %c0_i32_0 : i32, i32
  }
  func.func @transform_2(%arg0: i32) -> (i32, i32) {
    %c0_i32 = arith.constant 0 : i32
    %c0_i32_0 = arith.constant 0 : i32
    %c0_i32_1 = arith.constant 0 : i32
    return %c0_i32, %c0_i32_0 : i32, i32
  }
  func.func @transform_3(%arg0: i32) -> (i32, i32) {
    %c0_i32 = arith.constant 0 : i32
    %c0_i32_0 = arith.constant 0 : i32
    %c0_i32_1 = arith.constant 0 : i32
    return %c0_i32, %c0_i32_0 : i32, i32
  }
  func.func @transform_4(%arg0: i32) -> (i32, i32) {
    %c0_i32 = arith.constant 0 : i32
    %c0_i32_0 = arith.constant 0 : i32
    %c0_i32_1 = arith.constant 0 : i32
    return %c0_i32, %c0_i32_0 : i32, i32
  }
  func.func @transform_5(%arg0: i32) -> (i32, i32) {
    %c0_i32 = arith.constant 0 : i32
    %c0_i32_0 = arith.constant 0 : i32
    %c0_i32_1 = arith.constant 0 : i32
    return %c0_i32, %c0_i32_0 : i32, i32
  }
  func.func @transform_6(%arg0: i32) -> (i32, i32) {
    %c0_i32 = arith.constant 0 : i32
    %c0_i32_0 = arith.constant 0 : i32
    %c0_i32_1 = arith.constant 0 : i32
    return %c0_i32, %c0_i32_0 : i32, i32
  }
  func.func @transform_7(%arg0: i32) -> (i32, i32) {
    %c0_i32 = arith.constant 0 : i32
    %c0_i32_0 = arith.constant 0 : i32
    return %arg0, %c0_i32 : i32, i32
  }
}

</mosaic_0001>

<bundles_post_ra>
// kernel: dqn_forward.1
= control target key start
LH: loop header
LB: loop body
LE: loop exit
PB: predicated region body
PF: predicated region fallthrough
CT: control target
= control target key end

     0   :  { %vm35_vm0 = vcmask 64512   ;;  %v420_v0 = vmov 0.0   ;;  %vm421_vm1 = vmmov 0   ;;  %vm297_vm2 = vcmask 31744   ;;  %s615_s1 = inlined_call_operand.vmem [shape: f32[8,128], index: 1, kind: input, shape index: {}]   ;;  %s616_s0 = inlined_call_operand.vmem [shape: f32[8,8], index: 0, kind: input, shape index: {}]   ;;  %s617_s3 = inlined_call_operand.vmem [shape: f32[128,128], index: 3, kind: input, shape index: {}]   ;;  %s618_s5 = inlined_call_operand.vmem [shape: f32[128,4], index: 5, kind: input, shape index: {}]   ;;  %s619_s2 = inlined_call_operand.vmem [shape: f32[1,128], index: 2, kind: input, shape index: {}]   ;;  %s620_s4 = inlined_call_operand.vmem [shape: f32[1,128], index: 4, kind: input, shape index: {}]   ;;  %s621_s6 = inlined_call_operand.vmem [shape: f32[1,4], index: 6, kind: input, shape index: {}]   ;;  %s622_s7 = inlined_call_operand.vmem [shape: f32[8,4], index: 7, kind: output, shape index: {}]  }
   0x1   :  { %343 = vmatprep.subr.mxu0 %v420_v0  ;;  %v27_v1 = vld [vmem:[%s615_s1] sm:$0xff]  ;;  %345 = vmatprep.mubr.msk.f32.mxu0 %vm421_vm1, %v420_v0  ;;  %v125_v3 = vld [vmem:[%s617_s3 + $0x78] sm:$0xff]  ;;  %v124_v4 = vld [vmem:[%s617_s3 + $0x70] sm:$0xff] }
   0x2   :  { %v26_v2 = vld [vmem:[%s616_s0] sm:$0xff]  ;;  %344 = vmatpush3.msra.mxu0 %v27_v1  ;;  %348 = vmatprep.subr.mxu1 %v420_v0  ;;  %v123_v5 = vld [vmem:[%s617_s3 + $0x68] sm:$0xff]  ;;  %v121_v7 = vld [vmem:[%s617_s3 + $0x58] sm:$0xff] }
   0x3   :  { %346 = vmatmul.mubr.msk.f32.vlgmr.msra.gmra.mxu0 %vm35_vm0, %v26_v2  ;;  %349 = vmatpush3.msra.mxu1 %v125_v3  ;;  %v122_v6 = vld [vmem:[%s617_s3 + $0x60] sm:$0xff]  ;;  %v120_v8 = vld [vmem:[%s617_s3 + $0x50] sm:$0xff]  ;;  %v119_v9 = vld [vmem:[%s617_s3 + $0x48] sm:$0xff] }
   0x4   :  { %350 = vmatprep.subr.mxu1 %v420_v0  ;;  %380 = vmatprep.mubr.msk.f32.mxu1 %vm421_vm1, %v420_v0  ;;  %v118_v10 = vld [vmem:[%s617_s3 + $0x40] sm:$0xff]  ;;  %v117_v11 = vld [vmem:[%s617_s3 + $0x38] sm:$0xff]  ;;  %v116_v12 = vld [vmem:[%s617_s3 + $0x30] sm:$0xff] }
   0x5   :  { %351 = vmatpush3.msra.mxu1 %v124_v4  ;;  %383 = vmatprep.subr.mxu0 %v420_v0  ;;  %v115_v13 = vld [vmem:[%s617_s3 + $0x28] sm:$0xff]  ;;  %v114_v14 = vld [vmem:[%s617_s3 + $0x20] sm:$0xff]  ;;  %v113_v15 = vld [vmem:[%s617_s3 + $0x18] sm:$0xff] }
   0x6   :  { %352 = vmatprep.subr.mxu1 %v420_v0  ;;  %415 = vmatprep.mubr.msk.f32.mxu0 %vm421_vm1, %v420_v0  ;;  %v112_v16 = vld [vmem:[%s617_s3 + $0x10] sm:$0xff]  ;;  %v111_v17 = vld [vmem:[%s617_s3 + $0x8] sm:$0xff]  ;;  %v110_v18 = vld [vmem:[%s617_s3] sm:$0xff] }
   0x7   :  { %353 = vmatpush3.msra.mxu1 %v123_v5  ;;  %v219_v19 = vld [vmem:[%s618_s5 + $0x78] sm:$0xff]  ;;  %v218_v20 = vld [vmem:[%s618_s5 + $0x70] sm:$0xff]  ;;  %v217_v21 = vld [vmem:[%s618_s5 + $0x68] sm:$0xff] }
   0x8   :  { %354 = vmatprep.subr.mxu1 %v420_v0  ;;  %384 = vmatpush3.msra.mxu0 %v219_v19  ;;  %v216_v22 = vld [vmem:[%s618_s5 + $0x60] sm:$0xff]  ;;  %v215_v23 = vld [vmem:[%s618_s5 + $0x58] sm:$0xff]  ;;  %v214_v24 = vld [vmem:[%s618_s5 + $0x50] sm:$0xff] }
   0x9   :  { %355 = vmatpush3.msra.mxu1 %v122_v6  ;;  %385 = vmatprep.subr.mxu0 %v420_v0  ;;  %v213_v25 = vld [vmem:[%s618_s5 + $0x48] sm:$0xff]  ;;  %v212_v26 = vld [vmem:[%s618_s5 + $0x40] sm:$0xff]  ;;  %v211_v27 = vld [vmem:[%s618_s5 + $0x38] sm:$0xff] }
   0xa   :  { %356 = vmatprep.subr.mxu1 %v420_v0  ;;  %386 = vmatpush3.msra.mxu0 %v218_v20  ;;  %v210_v28 = vld [vmem:[%s618_s5 + $0x30] sm:$0xff]  ;;  %v209_v29 = vld [vmem:[%s618_s5 + $0x28] sm:$0xff]  ;;  %v208_v30 = vld [vmem:[%s618_s5 + $0x20] sm:$0xff] }
   0xb   :  { %357 = vmatpush3.msra.mxu1 %v121_v7  ;;  %387 = vmatprep.subr.mxu0 %v420_v0  ;;  %v207_v31 = vld [vmem:[%s618_s5 + $0x18] sm:$0xff]  ;;  %v303_v32 = vld [vmem:[%s619_s2] ss:$0 sm:$0xff]  ;;  %v206_v37 = vld [vmem:[%s618_s5 + $0x10] sm:$0xff] }
   0xc   :  { %358 = vmatprep.subr.mxu1 %v420_v0  ;;  %388 = vmatpush3.msra.mxu0 %v217_v21  ;;  %v205_v38 = vld [vmem:[%s618_s5 + $0x8] sm:$0xff]  ;;  %v204_v39 = vld [vmem:[%s618_s5] sm:$0xff] }
   0xd   :  { %359 = vmatpush3.msra.mxu1 %v120_v8  ;;  %389 = vmatprep.subr.mxu0 %v420_v0  ;;  %v305_v40 = vld [vmem:[%s620_s4] ss:$0 sm:$0xff] }
   0xe   :  { %360 = vmatprep.subr.mxu1 %v420_v0  ;;  %390 = vmatpush3.msra.mxu0 %v216_v22  ;;  %v306_v45 = vld [vmem:[%s621_s6] ss:$0 sm:$0xff] }
   0xf   :  { %361 = vmatpush3.msra.mxu1 %v119_v9  ;;  %391 = vmatprep.subr.mxu0 %v420_v0 }
  0x10   :  { %362 = vmatprep.subr.mxu1 %v420_v0  ;;  %392 = vmatpush3.msra.mxu0 %v215_v23 }
  0x11   :  { %363 = vmatpush3.msra.mxu1 %v118_v10  ;;  %393 = vmatprep.subr.mxu0 %v420_v0 }
  0x12   :  { %364 = vmatprep.subr.mxu1 %v420_v0  ;;  %394 = vmatpush3.msra.mxu0 %v214_v24 }
  0x13   :  { %365 = vmatpush3.msra.mxu1 %v117_v11  ;;  %395 = vmatprep.subr.mxu0 %v420_v0 }
  0x14   :  { %366 = vmatprep.subr.mxu1 %v420_v0  ;;  %396 = vmatpush3.msra.mxu0 %v213_v25 }
  0x15   :  { %367 = vmatpush3.msra.mxu1 %v116_v12  ;;  %397 = vmatprep.subr.mxu0 %v420_v0 }
  0x16   :  { %368 = vmatprep.subr.mxu1 %v420_v0  ;;  %398 = vmatpush3.msra.mxu0 %v212_v26 }
  0x17   :  { %369 = vmatpush3.msra.mxu1 %v115_v13  ;;  %399 = vmatprep.subr.mxu0 %v420_v0 }
  0x18   :  { %370 = vmatprep.subr.mxu1 %v420_v0  ;;  %400 = vmatpush3.msra.mxu0 %v211_v27 }
  0x19   :  { %371 = vmatpush3.msra.mxu1 %v114_v14  ;;  %401 = vmatprep.subr.mxu0 %v420_v0 }
  0x1a   :  { %372 = vmatprep.subr.mxu1 %v420_v0  ;;  %402 = vmatpush3.msra.mxu0 %v210_v28 }
  0x1b   :  { %373 = vmatpush3.msra.mxu1 %v113_v15  ;;  %403 = vmatprep.subr.mxu0 %v420_v0 }
  0x1c   :  { %374 = vmatprep.subr.mxu1 %v420_v0  ;;  %404 = vmatpush3.msra.mxu0 %v209_v29 }
  0x1d   :  { %375 = vmatpush3.msra.mxu1 %v112_v16  ;;  %405 = vmatprep.subr.mxu0 %v420_v0 }
  0x1e   :  { %376 = vmatprep.subr.mxu1 %v420_v0  ;;  %406 = vmatpush3.msra.mxu0 %v208_v30 }
  0x1f   :  { %377 = vmatpush3.msra.mxu1 %v111_v17  ;;  %407 = vmatprep.subr.mxu0 %v420_v0 }
  0x20   :  { %378 = vmatprep.subr.mxu1 %v420_v0  ;;  %408 = vmatpush3.msra.mxu0 %v207_v31 }
  0x21   :  { %379 = vmatpush3.msra.mxu1 %v110_v18  ;;  %409 = vmatprep.subr.mxu0 %v420_v0 }
  0x22   :  { %410 = vmatpush3.msra.mxu0 %v206_v37 }
  0x23   :  { %411 = vmatprep.subr.mxu0 %v420_v0 }
  0x24   :  { %412 = vmatpush3.msra.mxu0 %v205_v38 }
  0x25   :  { %413 = vmatprep.subr.mxu0 %v420_v0 }
  0x26   :  { %414 = vmatpush3.msra.mxu0 %v204_v39 }
  0xc3   :  { %v105_v33 = vpop.f32.mrf.mxu0 }
  0xc4   :  { %v106_v34 = vadd.f32 %v303_v32, %v105_v33 }
  0xc5   :  { %v347_v35 = vpop.f32.mrf.mxu0 }
  0xc6   :  { %v109_v36 = vmax.f32 %v106_v34, 0.0 }
  0xc8   :  { %381 = vmatmul.mubr.f32.vlgmr.msra.gmra.mxu1 %v109_v36 }
 0x188   :  { %v199_v41 = vpop.f32.mrf.mxu1 }
 0x189   :  { %v200_v42 = vadd.f32 %v305_v40, %v199_v41 }
 0x18a   :  { %v382_v43 = vpop.f32.mrf.mxu1 }
 0x18b   :  { %v203_v44 = vmax.f32 %v200_v42, 0.0 }
 0x18d   :  { %416 = vmatmul.mubr.f32.vlgmr.msra.gmra.mxu0 %v203_v44 }
 0x24d   :  { %v293_v46 = vpop.f32.mrf.mxu0 }
 0x24e   :  { %v294_v47 = vadd.f32 %v306_v45, %v293_v46 }
 0x24f   :  { %v417_v48 = vpop.f32.mrf.mxu0 }
 0x250   :  { %298 = vst.msk [vmem:[%s622_s7] sm:$0xff] %vm297_vm2, %v294_v47 }

</bundles_post_ra>
